<compile_context>
chip_gen: v5e
topology: v5e:2x2
jax: 0.10.0
libtpu: 0.0.40
codegen_flags: <defaults>
</compile_context>

<pallas_src>
import jax
import jax.numpy as jnp
from jax.experimental import pallas as pl
from jax.experimental.pallas import tpu as pltpu

HIDDEN = 64        # module default hidden_dim (multiple of 8 -> sublane aligned)
MAX_TILE_B = 1024  # batch lanes per grid step (sweep 512/1024/2048 if desired)


def _round_up(v, m):
    return ((v + m - 1) // m) * m


def _mxu_prefers_bf16():
    """bf16 MXU operands pay off on v6e/v7x; keep pure f32 on v5e and older."""
    try:
        kind = jax.devices()[0].device_kind.lower()
    except Exception:
        return False
    return any(s in kind for s in ("v6", "v7", "tpu7"))


def _mlp_kernel(xt_ref, aux_ref, w2_ref, out_ref):
    """One batch tile, batch on the lane axis.

    xt_ref  : (2, TB) f32   row 0 = x, row 1 = t (float; 1/1000 already folded into aux)
    aux_ref : (H, 8)  f32   cols = [w1x, w1t/1000, b1, b2, w3, b3, 0, 0]
    w2_ref  : (H, H)  f32 or bf16 (W2^T; dtype chosen by the wrapper per chip)
    out_ref : (1, TB) f32
    """
    x_row = xt_ref[0:1, :]                          # (1, TB)
    t_row = xt_ref[1:2, :]                          # (1, TB)

    w1x = aux_ref[:, 0:1]                           # (H, 1)
    w1t = aux_ref[:, 1:2]                           # (H, 1)  already scaled by 1/1000
    b1 = aux_ref[:, 2:3]                            # (H, 1)
    b2 = aux_ref[:, 3:4]                            # (H, 1)
    w3 = aux_ref[:, 4:5]                            # (H, 1)
    b3 = aux_ref[0:1, 5:6]                          # (1, 1)

    # L1: Linear(2, H) + ReLU as lane-broadcast VPU multiply-adds (no K=2 matmul).
    h1 = jnp.maximum(w1x * x_row + w1t * t_row + b1, 0.0)          # (H, TB) f32

    # L2: Linear(H, H) + ReLU on the MXU, f32 accumulation.  Operand dtype follows
    # w2_ref (bf16 on v6e/v7x, f32 on v5e).
    h2 = jnp.dot(w2_ref[...], h1.astype(w2_ref.dtype),
                 preferred_element_type=jnp.float32) + b2
    h2 = jnp.maximum(h2, 0.0)                                      # (H, TB) f32

    # L3: Linear(H, 1) as broadcast-multiply + sublane (XLU) reduce -> lane-dense row.
    out = jnp.sum(w3 * h2, axis=0, keepdims=True) + b3             # (1, TB)
    out_ref[...] = out.astype(out_ref.dtype)


def simple_diffusion_forward(x, t, params, *, tile_b=None, use_bf16_matmul=None):
    """x: (B, 1) float32, t: (B,) int -> (B, 1) float32."""
    w1, b1, w2, b2, w3, b3 = params                 # w stored (in, out); b stored (1, out)
    H = w1.shape[1]
    B = x.shape[0]

    if use_bf16_matmul is None:
        use_bf16_matmul = _mxu_prefers_bf16()

    if tile_b is None:
        # Large tiles amortize per-step overhead; B > MAX_TILE_B gives >= 2 tiles
        # (so v7x megacore can shard the "parallel" batch axis).
        tile_b = min(MAX_TILE_B, _round_up(B, 128))
    b_pad = _round_up(B, tile_b)
    n_tiles = b_pad // tile_b

    # Batch on the lane axis: one stacked (2, B) input (x row + t row) -> a single
    # input DMA stream per grid step instead of two.
    xt = jnp.concatenate(
        [x.astype(jnp.float32).reshape(1, B),
         t.astype(jnp.float32).reshape(1, B)], axis=0)             # (2, B)
    if b_pad != B:
        # Only pad in the ragged case; aligned batches skip this extra HBM pass.
        xt = jnp.pad(xt, ((0, 0), (0, b_pad - B)))

    # Pack all small parameters into one (H, 8) constant.  The t/1000 embedding
    # scale is folded into the w1t column so the kernel never divides.
    aux = jnp.concatenate(
        [w1[0].reshape(H, 1),
         (w1[1] * (1.0 / 1000.0)).reshape(H, 1),
         b1.reshape(H, 1),
         b2.reshape(H, 1),
         w3.reshape(H, 1),
         jnp.broadcast_to(b3.reshape(1, 1), (H, 1)),
         jnp.zeros((H, 2), jnp.float32)], axis=1).astype(jnp.float32)   # (H, 8)

    w2t = w2.T
    w2t = w2t.astype(jnp.bfloat16 if use_bf16_matmul else jnp.float32)  # (H, H)

    flops = 2 * b_pad * (2 * H + H * H + H)
    bytes_accessed = 4 * (2 * b_pad + b_pad + H * 8) + w2t.dtype.itemsize * H * H

    out_row = pl.pallas_call(
        _mlp_kernel,
        out_shape=jax.ShapeDtypeStruct((1, b_pad), jnp.float32),
        grid_spec=pltpu.PrefetchScalarGridSpec(
            num_scalar_prefetch=0,
            grid=(n_tiles,),
            in_specs=[
                pl.BlockSpec((2, tile_b), lambda i: (0, i)),   # stacked x/t lane tile
                pl.BlockSpec((H, 8), lambda i: (0, 0)),        # packed small params (resident)
                pl.BlockSpec((H, H), lambda i: (0, 0)),        # w2^T (resident)
            ],
            out_specs=pl.BlockSpec((1, tile_b), lambda i: (0, i)),
        ),
        compiler_params=pltpu.CompilerParams(
            dimension_semantics=("parallel",),   # batch axis: megacore-shardable
        ),
        cost_estimate=pl.CostEstimate(
            flops=flops, transcendentals=0, bytes_accessed=bytes_accessed),
    )(xt, aux, w2t)

    # (1, B) row-major has the same byte layout as (B, 1): reshape is metadata only.
    if b_pad == B:
        return out_row.reshape(B, 1)
    return out_row[0, :B].reshape(B, 1)


def init_params(key, hidden_dim=HIDDEN):
    """Deterministic synthetic init matching nn.Linear shapes (stored transposed:
    W is (in, out) so the reference math is x @ W + b)."""
    k1, k2, k3 = jax.random.split(key, 3)

    def lin(k, fan_in, fan_out):
        bound = 1.0 / jnp.sqrt(jnp.float32(fan_in))
        kw, kb = jax.random.split(k)
        w = jax.random.uniform(kw, (fan_in, fan_out), jnp.float32, -bound, bound)
        b = jax.random.uniform(kb, (1, fan_out), jnp.float32, -bound, bound)
        return w, b

    w1, b1 = lin(k1, 2, hidden_dim)
    w2, b2 = lin(k2, hidden_dim, hidden_dim)
    w3, b3 = lin(k3, hidden_dim, 1)
    return (w1, b1, w2, b2, w3, b3)


def _reference_forward(x, t, params):
    w1, b1, w2, b2, w3, b3 = params
    t_emb = t.astype(jnp.float32)[:, None] / 1000.0
    inp = jnp.concatenate([x.astype(jnp.float32), t_emb], axis=-1)
    h1 = jnp.maximum(inp @ w1 + b1, 0.0)
    h2 = jnp.maximum(h1 @ w2 + b2, 0.0)
    return h2 @ w3 + b3


if __name__ == "__main__":
    key = jax.random.PRNGKey(0)
    kx, kt, kp = jax.random.split(key, 3)
    params = init_params(kp, HIDDEN)

    # bf16 MXU path (v6e/v7x) perturbs results slightly -> wider tolerance there.
    tol = 3e-2 if _mxu_prefers_bf16() else 1e-4

    # Small batch: single grid step, single 128-lane tile.
    B = 8
    x = jax.random.normal(kx, (B, 1), jnp.float32)
    t = jax.random.randint(kt, (B,), 0, 1000, jnp.int32)
    out = jax.block_until_ready(simple_diffusion_forward(x, t, params))
    ref = _reference_forward(x, t, params)
    assert out.shape == (B, 1)
    assert jnp.allclose(out, ref, atol=tol, rtol=tol), float(jnp.max(jnp.abs(out - ref)))

    # Ragged multi-step batch grid (explicit small tile to exercise tiling + padding path).
    B2 = 300
    x2 = jax.random.normal(kx, (B2, 1), jnp.float32)
    t2 = jax.random.randint(kt, (B2,), 0, 1000, jnp.int32)
    out2 = jax.block_until_ready(simple_diffusion_forward(x2, t2, params, tile_b=128))
    ref2 = _reference_forward(x2, t2, params)
    assert out2.shape == (B2, 1)
    assert jnp.allclose(out2, ref2, atol=tol, rtol=tol), float(jnp.max(jnp.abs(out2 - ref2)))

    print("KERNEL_OK")
</pallas_src>

<mosaic_0001>
module attributes {stable_mosaic.version = 11 : i64} {
  func.func @_mlp_kernel(%arg0: i32, %arg1: memref<2x128xf32, #tpu.memory_space<vmem>>, %arg2: memref<64x8xf32, #tpu.memory_space<vmem>>, %arg3: memref<64x64xf32, #tpu.memory_space<vmem>>, %arg4: memref<1x128xf32, #tpu.memory_space<vmem>>) attributes {dimension_semantics = [#tpu.dimension_semantics<parallel>], iteration_bounds = array<i64: 1>, scalar_prefetch = 0 : i64, scratch_operands = 0 : i64, tpu.core_type = #tpu.core_type<tc>, window_params = [{transform_indices = @transform_0, window_bounds = array<i64: 2, 128>}, {pipeline_mode = #tpu.pipeline_mode<synchronous>, transform_indices = @transform_1, window_bounds = array<i64: 64, 8>}, {pipeline_mode = #tpu.pipeline_mode<synchronous>, transform_indices = @transform_2, window_bounds = array<i64: 64, 64>}, {transform_indices = @transform_3, window_bounds = array<i64: 1, 128>}]} {
    %c0 = arith.constant 0 : index
    %c0_0 = arith.constant 0 : index
    %0 = vector.load %arg1[%c0, %c0_0] : memref<2x128xf32, #tpu.memory_space<vmem>>, vector<1x128xf32>
    %c1 = arith.constant 1 : index
    %c0_1 = arith.constant 0 : index
    %1 = vector.load %arg1[%c1, %c0_1] : memref<2x128xf32, #tpu.memory_space<vmem>>, vector<1x128xf32>
    %c0_2 = arith.constant 0 : index
    %c0_3 = arith.constant 0 : index
    %2 = vector.load %arg2[%c0_2, %c0_3] : memref<64x8xf32, #tpu.memory_space<vmem>>, vector<64x1xf32>
    %c0_4 = arith.constant 0 : index
    %c1_5 = arith.constant 1 : index
    %3 = vector.load %arg2[%c0_4, %c1_5] : memref<64x8xf32, #tpu.memory_space<vmem>>, vector<64x1xf32>
    %c0_6 = arith.constant 0 : index
    %c2 = arith.constant 2 : index
    %4 = vector.load %arg2[%c0_6, %c2] : memref<64x8xf32, #tpu.memory_space<vmem>>, vector<64x1xf32>
    %c0_7 = arith.constant 0 : index
    %c3 = arith.constant 3 : index
    %5 = vector.load %arg2[%c0_7, %c3] : memref<64x8xf32, #tpu.memory_space<vmem>>, vector<64x1xf32>
    %c0_8 = arith.constant 0 : index
    %c4 = arith.constant 4 : index
    %6 = vector.load %arg2[%c0_8, %c4] : memref<64x8xf32, #tpu.memory_space<vmem>>, vector<64x1xf32>
    %c0_9 = arith.constant 0 : index
    %c5 = arith.constant 5 : index
    %7 = vector.load %arg2[%c0_9, %c5] : memref<64x8xf32, #tpu.memory_space<vmem>>, vector<1x1xf32>
    %8 = vector.broadcast %2 : vector<64x1xf32> to vector<64x128xf32>
    %9 = vector.broadcast %0 : vector<1x128xf32> to vector<64x128xf32>
    %10 = arith.mulf %8, %9 : vector<64x128xf32>
    %11 = vector.broadcast %3 : vector<64x1xf32> to vector<64x128xf32>
    %12 = vector.broadcast %1 : vector<1x128xf32> to vector<64x128xf32>
    %13 = arith.mulf %11, %12 : vector<64x128xf32>
    %14 = arith.addf %10, %13 : vector<64x128xf32>
    %15 = vector.broadcast %4 : vector<64x1xf32> to vector<64x128xf32>
    %16 = arith.addf %14, %15 : vector<64x128xf32>
    %cst = arith.constant 0.000000e+00 : f32
    %17 = vector.broadcast %cst : f32 to vector<64x128xf32>
    %18 = arith.maximumf %16, %17 : vector<64x128xf32>
    %c0_10 = arith.constant 0 : index
    %c0_11 = arith.constant 0 : index
    %19 = vector.load %arg3[%c0_10, %c0_11] : memref<64x64xf32, #tpu.memory_space<vmem>>, vector<64x64xf32>
    %cst_12 = arith.constant dense<0.000000e+00> : vector<64x128xf32>
    %20 = tpu.matmul %19, %18, %cst_12 {dimension_numbers = #tpu.dot_dimension_numbers<[1], [0], [0], [1], [0, 0, 1, 1], [], []>} : vector<64x64xf32>, vector<64x128xf32>, vector<64x128xf32> -> vector<64x128xf32>
    %21 = vector.broadcast %5 : vector<64x1xf32> to vector<64x128xf32>
    %22 = arith.addf %20, %21 : vector<64x128xf32>
    %cst_13 = arith.constant 0.000000e+00 : f32
    %23 = vector.broadcast %cst_13 : f32 to vector<64x128xf32>
    %24 = arith.maximumf %22, %23 : vector<64x128xf32>
    %25 = vector.broadcast %6 : vector<64x1xf32> to vector<64x128xf32>
    %26 = arith.mulf %25, %24 : vector<64x128xf32>
    %cst_14 = arith.constant dense<0.000000e+00> : vector<128xf32>
    %27 = vector.multi_reduction <add>, %26, %cst_14 [0] : vector<64x128xf32> to vector<128xf32>
    %28 = vector.shape_cast %27 : vector<128xf32> to vector<1x128xf32>
    %29 = vector.broadcast %7 : vector<1x1xf32> to vector<1x128xf32>
    %30 = arith.addf %28, %29 : vector<1x128xf32>
    %c0_15 = arith.constant 0 : index
    %c0_16 = arith.constant 0 : index
    %31 = vector.load %arg4[%c0_15, %c0_16] : memref<1x128xf32, #tpu.memory_space<vmem>>, vector<1x128xf32>
    tpu.vector_store %arg4[%c0_15, %c0_16], %30 {strides = array<i32>} : memref<1x128xf32, #tpu.memory_space<vmem>>, vector<1x128xf32>,
    return
  }
  func.func @transform_0(%arg0: i32) -> (i32, i32) {
    %c0_i32 = arith.constant 0 : i32
    %c0_i32_0 = arith.constant 0 : i32
    return %c0_i32, %arg0 : i32, i32
  }
  func.func @transform_1(%arg0: i32) -> (i32, i32) {
    %c0_i32 = arith.constant 0 : i32
    %c0_i32_0 = arith.constant 0 : i32
    %c0_i32_1 = arith.constant 0 : i32
    return %c0_i32, %c0_i32_0 : i32, i32
  }
  func.func @transform_2(%arg0: i32) -> (i32, i32) {
    %c0_i32 = arith.constant 0 : i32
    %c0_i32_0 = arith.constant 0 : i32
    %c0_i32_1 = arith.constant 0 : i32
    return %c0_i32, %c0_i32_0 : i32, i32
  }
  func.func @transform_3(%arg0: i32) -> (i32, i32) {
    %c0_i32 = arith.constant 0 : i32
    %c0_i32_0 = arith.constant 0 : i32
    return %c0_i32, %arg0 : i32, i32
  }
}

</mosaic_0001>

<bundles_post_ra>
// kernel: tpu_custom_call.1
= control target key start
LH: loop header
LB: loop body
LE: loop exit
PB: predicated region body
PF: predicated region fallthrough
CT: control target
= control target key end

     0   :  { %v454_v3 = vmov 1   ;;  %v455_v4 = vmov 0   ;;  %s641_s0 = inlined_call_operand.vmem [shape: f32[2,128], index: 0, kind: input, shape index: {}]   ;;  %s642_s1 = inlined_call_operand.vmem [shape: f32[64,8], index: 1, kind: input, shape index: {}]   ;;  %s643_s2 = inlined_call_operand.vmem [shape: f32[64,64], index: 2, kind: input, shape index: {}]   ;;  %s644_s3 = inlined_call_operand.hbm [shape: f32[1,128], index: 3, kind: output, shape index: {}]  }
   0x1   :  { %v484_v0 = vld [vmem:[%s642_s1 + $0x38] sm:$0xff]  ;;  %v489_v1 = vld [vmem:[%s642_s1 + $0x10] sm:$0xff]  ;;  %v494_v2 = vld [vmem:[%s642_s1] sm:$0xff]  ;;  %403 = vset.pattern.permute.xlu2 %v454_v3  ;;  %402 = vset.pattern.permute.xlu1 %v455_v4 }
   0x2   :  { %401 = vset.pattern.permute.xlu0 %v455_v4  ;;  %104 = vperm.xlu2 %403, %v484_v0  }
   0x3   :  { %38 = vperm.xlu1 %402, %v489_v1   ;;  %28 = vperm.xlu0 %401, %v494_v2  }
   0x4   :  { %8 = vsyncpa [#allocation3], 0  ;;  %v502_v5 = vld [vmem:[%s642_s1 + $0x8] sm:$0xff]  ;;  %v507_v6 = vld [vmem:[%s642_s1 + $0x30] sm:$0xff]  ;;  %v456_v9 = vmov 2   ;;  %v457_v30 = vmov 3  }
   0x5   :  { %v515_v7 = vld [vmem:[%s642_s1 + $0x28] sm:$0xff]  ;;  %v523_v8 = vld [vmem:[%s642_s1 + $0x20] sm:$0xff]  ;;  %v531_v10 = vld [vmem:[%s642_s1 + $0x18] sm:$0xff]  ;;  %v458_v55 = vmov 4   ;;  %vm212_vm0 = vcmask 523264   ;;  %s353_s24 = sshll.u32 %s644_s3, 4  ;;  %s354_s24 = int_to_ptr.hbm [resolvable:$true] %s353_s24 }
   0x6   :  { %v552_v22 = vld [vmem:[%s641_s0 + $0x1] ss:$0 sm:$0xff]  ;;  %v557_v23 = vld [vmem:[%s641_s0] ss:$0 sm:$0xff] }
   0xa   :  { %404 = vset.pattern.permute.xlu2 %v455_v4 }
   0xb   :  { %63 = vperm.xlu1 %402, %v484_v0   ;;  %33 = vperm.xlu0 %401, %v502_v5  }
   0xc   :  { %58 = vperm.xlu2 %404, %v507_v6  }
  0x13   :  { %53 = vperm.xlu1 %402, %v515_v7   ;;  %405 = vset.pattern.permute.xlu0 %v454_v3 }
  0x14   :  { %406 = vset.pattern.permute.xlu2 %v454_v3  ;;  %100 = vperm.xlu0 %405, %v507_v6  }
  0x15   :  { %96 = vperm.xlu2 %406, %v515_v7  }
  0x1b   :  { %407 = vset.pattern.permute.xlu1 %v456_v9 }
  0x1c   :  { %153 = vperm.xlu1 %407, %v484_v0   ;;  %92 = vperm.xlu0 %405, %v523_v8  }
  0x1d   :  { %408 = vset.pattern.permute.xlu2 %v455_v4 }
  0x1e   :  { %48 = vperm.xlu2 %408, %v523_v8  }
  0x24   :  { %149 = vperm.xlu1 %407, %v507_v6   ;;  %88 = vperm.xlu0 %405, %v531_v10  }
  0x26   :  { %43 = vperm.xlu2 %408, %v531_v10  }
  0x2c   :  { %145 = vperm.xlu1 %407, %v515_v7   ;;  %410 = vset.pattern.permute.xlu0 %v456_v9 }
  0x2d   :  { %141 = vperm.xlu0 %410, %v523_v8  }
  0x2e   :  { %409 = vset.pattern.permute.xlu2 %v454_v3 }
  0x2f   :  { %84 = vperm.xlu2 %409, %v489_v1  }
  0x34   :  { %411 = vset.pattern.permute.xlu1 %v454_v3 }
  0x35   :  { %80 = vperm.xlu1 %411, %v502_v5   ;;  %129 = vperm.xlu0 %410, %v502_v5  }
  0x37   :  { %412 = vset.pattern.permute.xlu2 %v456_v9 }
  0x38   :  { %137 = vperm.xlu2 %412, %v531_v10  }
  0x3d   :  { %76 = vperm.xlu1 %411, %v494_v2   ;;  %415 = vset.pattern.permute.xlu0 %v457_v30 }
  0x3e   :  { %185 = vperm.xlu0 %415, %v502_v5  }
  0x40   :  { %133 = vperm.xlu2 %412, %v489_v1  }
  0x45   :  { %413 = vset.pattern.permute.xlu1 %v456_v9 }
  0x46   :  { %125 = vperm.xlu1 %413, %v494_v2   ;;  %417 = vset.pattern.permute.xlu0 %v458_v55 }
  0x47   :  { %287 = vperm.xlu0 %417, %v494_v2  }
  0x48   :  { %414 = vset.pattern.permute.xlu2 %v457_v30 }
  0x49   :  { %181 = vperm.xlu2 %414, %v494_v2  }
  0x4e   :  { %416 = vset.pattern.permute.xlu1 %v457_v30 }
  0x4f   :  { %189 = vperm.xlu1 %416, %v489_v1   ;;  %303 = vperm.xlu0 %417, %v523_v8  }
  0x51   :  { %193 = vperm.xlu2 %414, %v531_v10  }
  0x57   :  { %197 = vperm.xlu1 %416, %v523_v8   ;;  %311 = vperm.xlu0 %417, %v507_v6  }
  0x59   :  { %201 = vperm.xlu2 %414, %v515_v7  }
  0x5c   :  { %v105_v11 = vpop.permute.xlu2 %104 }
  0x5d   :  { %v115_v25 = vmul.f32 %v552_v22, %v105_v11 }
  0x5f   :  { %418 = vset.pattern.permute.xlu1 %v458_v55 }
  0x60   :  { %291 = vperm.xlu1 %418, %v502_v5  }
  0x61   :  { %419 = vset.pattern.permute.xlu2 %v458_v55 }
  0x62   :  { %295 = vperm.xlu2 %419, %v489_v1  }
  0x66   :  { %v59_v12 = vpop.permute.xlu2 %58 }
  0x67   :  { %v73_v34 = vmul.f32 %v557_v23, %v59_v12 }
  0x68   :  { %299 = vperm.xlu1 %418, %v531_v10  }
  0x6a   :  { %420 = vset.pattern.permute.xlu2 %v457_v30 }
  0x6b   :  { %205 = vperm.xlu2 %420, %v507_v6   ;;  %v176_v6 = vld [vmem:[%s643_s2 + $0x20] sm:$0xff] }
  0x6f   :  { %v97_v13 = vpop.permute.xlu2 %96 }
  0x70   :  { %v113_v40 = vmul.f32 %v552_v22, %v97_v13  ;;  %421 = vset.pattern.permute.xlu1 %v457_v30 }
  0x71   :  { %209 = vperm.xlu1 %421, %v484_v0  }
  0x73   :  { %422 = vset.pattern.permute.xlu2 %v458_v55 }
  0x74   :  { %307 = vperm.xlu2 %422, %v515_v7   ;;  %v25_v7 = vld [vmem:[%s642_s1] sm:$0x1]  ;;  %s460_s1 = smov [#allocation2]  }
  0x75   :  { %v39_v14 = vpop.permute.xlu1 %38  ;;  %v545_v15 = vpop.permute.xlu0 %28 }
  0x76   :  { %v69_v52 = vmul.f32 %v557_v23, %v39_v14  ;;  %v67_v8 = vmul.f32 %v557_v23, %v545_v15  ;;  %v178_v15 = vld [vmem:[%s643_s2 + $0x30] sm:$0xff] }
  0x78   :  { %v49_v16 = vpop.permute.xlu2 %48 }
  0x79   :  { %v71_v44 = vmul.f32 %v557_v23, %v49_v16  ;;  %423 = vset.pattern.permute.xlu1 %v458_v55 }
  0x7a   :  { %315 = vperm.xlu1 %423, %v484_v0   ;;  %v179_v0 = vld [vmem:[%s643_s2 + $0x38] sm:$0xff] }
  0x7d   :  { %v64_v17 = vpop.permute.xlu1 %63  ;;  %v547_v18 = vpop.permute.xlu0 %33 }
  0x7e   :  { %v74_v24 = vmul.f32 %v557_v23, %v64_v17  ;;  %v68_v2 = vmul.f32 %v557_v23, %v547_v18 }
  0x80   :  { %v44_v19 = vpop.permute.xlu2 %43  ;;  %v123_v27 = vadd.f32 %v115_v25, %v74_v24  ;;  %v177_v24 = vld [vmem:[%s643_s2 + $0x28] sm:$0xff] }
  0x81   :  { %v70_v46 = vmul.f32 %v557_v23, %v44_v19  ;;  %v459_v19 = vmov 5  }
  0x82   :  { %425 = vset.pattern.permute.xlu0 %v459_v19  ;;  %424 = vset.pattern.permute.xlu2 %v459_v19 }
  0x83   :  { %341 = vperm.xlu2 %424, %v25_v7  }
  0x85   :  { %v54_v20 = vpop.permute.xlu1 %53 }
  0x86   :  { %v101_v21 = vpop.permute.xlu0 %100  ;;  %v72_v41 = vmul.f32 %v557_v23, %v54_v20  ;;  %v172_v20 = vld [vmem:[%s643_s2] sm:$0xff]  ;;  %v175_v23 = vld [vmem:[%s643_s2 + $0x18] sm:$0xff] }
  0x87   :  { %v114_v32 = vmul.f32 %v552_v22, %v101_v21  ;;  %v174_v21 = vld [vmem:[%s643_s2 + $0x10] sm:$0xff] }
  0x88   :  { %v121_v49 = vadd.f32 %v113_v40, %v72_v41 }
  0x89   :  { %v85_v26 = vpop.permute.xlu2 %84  ;;  %v122_v36 = vadd.f32 %v114_v32, %v73_v34 }
  0x8a   :  { %v110_v47 = vmul.f32 %v552_v22, %v85_v26 }
  0x8c   :  { %v118_v59 = vadd.f32 %v110_v47, %v69_v52 }
  0x8e   :  { %v154_v28 = vpop.permute.xlu1 %153  ;;  %v93_v29 = vpop.permute.xlu0 %92 }
  0x8f   :  { %v163_v31 = vadd.f32 %v154_v28, %v123_v27  ;;  %v112_v45 = vmul.f32 %v552_v22, %v93_v29 }
  0x91   :  { %v171_v33 = vmax.f32 %v163_v31, 0.0  ;;  %v120_v51 = vadd.f32 %v112_v45, %v71_v44 }
  0x92   :  { %v138_v35 = vpop.permute.xlu2 %137 }
  0x93   :  { %245 = vmatpush.msra.mxu0 %v171_v33  ;;  %370 = vmatpush.msra.mxu1 %v171_v33 }
  0x94   :  { %371 = vmatpush.msra.mxu2 %v171_v33  ;;  %372 = vmatpush.msra.mxu3 %v171_v33 }
  0x96   :  { %v150_v37 = vpop.permute.xlu1 %149  ;;  %v89_v38 = vpop.permute.xlu0 %88 }
  0x97   :  { %v162_v39 = vadd.f32 %v150_v37, %v122_v36  ;;  %v111_v43 = vmul.f32 %v552_v22, %v89_v38 }
  0x99   :  { %v170_v42 = vmax.f32 %v162_v39, 0.0  ;;  %v119_v48 = vadd.f32 %v111_v43, %v70_v46 }
  0x9a   :  { %v134_v56 = vpop.permute.xlu2 %133 }
  0x9b   :  { %246 = vmatpush.msra.mxu0 %v170_v42  ;;  %373 = vmatpush.msra.mxu1 %v170_v42  ;;  %v159_v58 = vadd.f32 %v138_v35, %v119_v48  ;;  %v158_v62 = vadd.f32 %v134_v56, %v118_v59 }
  0x9c   :  { %374 = vmatpush.msra.mxu2 %v170_v42  ;;  %375 = vmatpush.msra.mxu3 %v170_v42 }
  0x9d   :  { %v167_v63 = vmax.f32 %v159_v58, 0.0  ;;  %v166_v3 = vmax.f32 %v158_v62, 0.0 }
  0x9e   :  { %v146_v50 = vpop.permute.xlu1 %145 }
  0x9f   :  { %v161_v53 = vadd.f32 %v146_v50, %v121_v49  ;;  %v142_v54 = vpop.permute.xlu0 %141 }
  0xa0   :  { %v160_v57 = vadd.f32 %v142_v54, %v120_v51 }
  0xa1   :  { %v169_v60 = vmax.f32 %v161_v53, 0.0 }
  0xa2   :  { %v168_v61 = vmax.f32 %v160_v57, 0.0 }
  0xa3   :  { %247 = vmatpush.msra.mxu0 %v169_v60  ;;  %376 = vmatpush.msra.mxu1 %v169_v60  ;;  %v182_v25 = vpop.permute.xlu2 %181 }
  0xa4   :  { %377 = vmatpush.msra.mxu2 %v169_v60  ;;  %378 = vmatpush.msra.mxu3 %v169_v60 }
  0xa5   :  { %248 = vmatpush.msra.mxu0 %v168_v61  ;;  %379 = vmatpush.msra.mxu1 %v168_v61 }
  0xa6   :  { %380 = vmatpush.msra.mxu2 %v168_v61  ;;  %381 = vmatpush.msra.mxu3 %v168_v61 }
  0xa7   :  { %v81_v4 = vpop.permute.xlu1 %80  ;;  %249 = vmatpush.msra.mxu0 %v167_v63  ;;  %382 = vmatpush.msra.mxu1 %v167_v63  ;;  %v130_v9 = vpop.permute.xlu0 %129 }
  0xa8   :  { %v109_v5 = vmul.f32 %v552_v22, %v81_v4  ;;  %383 = vmatpush.msra.mxu2 %v167_v63  ;;  %384 = vmatpush.msra.mxu3 %v167_v63 }
  0xa9   :  { %250 = vmatpush.msra.mxu0 %v166_v3  ;;  %385 = vmatpush.msra.mxu1 %v166_v3 }
  0xaa   :  { %386 = vmatpush.msra.mxu2 %v166_v3  ;;  %387 = vmatpush.msra.mxu3 %v166_v3  ;;  %v117_v11 = vadd.f32 %v109_v5, %v68_v2 }
  0xab   :  { %v194_v27 = vpop.permute.xlu2 %193 }
  0xac   :  { %v157_v12 = vadd.f32 %v130_v9, %v117_v11 }
  0xae   :  { %v165_v13 = vmax.f32 %v157_v12, 0.0 }
  0xaf   :  { %v77_v14 = vpop.permute.xlu1 %76 }
  0xb0   :  { %251 = vmatpush.msra.mxu0 %v165_v13  ;;  %388 = vmatpush.msra.mxu1 %v165_v13  ;;  %v108_v16 = vmul.f32 %v552_v22, %v77_v14  ;;  %v173_v22 = vld [vmem:[%s643_s2 + $0x8] sm:$0xff]  ;;  %v186_v30 = vpop.permute.xlu0 %185  ;;  %s351_s2 = sshll.u32 %s460_s1, 4  ;;  %s352_s2 = int_to_ptr.vmem [resolvable:$true] %s351_s2 }
  0xb1   :  { %389 = vmatpush.msra.mxu2 %v165_v13  ;;  %390 = vmatpush.msra.mxu3 %v165_v13 }
  0xb2   :  { %v116_v1 = vadd.f32 %v108_v16, %v67_v8 }
  0xb3   :  { %v202_v29 = vpop.permute.xlu2 %201 }
  0xb8   :  { %v126_v10 = vpop.permute.xlu1 %125 }
  0xb9   :  { %v156_v17 = vadd.f32 %v126_v10, %v116_v1  ;;  %v288_v35 = vpop.permute.xlu0 %287 }
  0xbb   :  { %v164_v18 = vmax.f32 %v156_v17, 0.0 }
  0xbc   :  { %v296_v32 = vpop.permute.xlu2 %295 }
  0xbd   :  { %252 = vmatpush.msra.mxu0 %v164_v18  ;;  %391 = vmatpush.msra.mxu1 %v164_v18 }
  0xbe   :  { %392 = vmatpush.msra.mxu2 %v164_v18  ;;  %393 = vmatpush.msra.mxu3 %v164_v18 }
  0xbf   :  { %362 = vmatmul.msk.f32.vlgmr.msra.gmra.mxu0 %vm212_vm0, %v172_v20  ;;  %364 = vmatmul.msk.f32.vlgmr.msra.gmra.mxu1 %vm212_vm0, %v174_v21 }
  0xc0   :  { %366 = vmatmul.msk.f32.vlgmr.msra.gmra.mxu2 %vm212_vm0, %v176_v6  ;;  %368 = vmatmul.msk.f32.vlgmr.msra.gmra.mxu3 %vm212_vm0, %v178_v15 }
  0xc1   :  { %v190_v26 = vpop.permute.xlu1 %189  ;;  %v304_v50 = vpop.permute.xlu0 %303 }
  0xc5   :  { %v206_v46 = vpop.permute.xlu2 %205 }
  0xc7   :  { %363 = vmatmul.msk.f32.gmra.mxu0 %vm212_vm0, %v173_v22  ;;  %365 = vmatmul.msk.f32.gmra.mxu1 %vm212_vm0, %v175_v23 }
  0xc8   :  { %367 = vmatmul.msk.f32.gmra.mxu2 %vm212_vm0, %v177_v24  ;;  %369 = vmatmul.msk.f32.gmra.mxu3 %vm212_vm0, %v179_v0 }
  0xc9   :  { %v198_v28 = vpop.permute.xlu1 %197  ;;  %v312_v16 = vpop.permute.xlu0 %311 }
  0xce   :  { %v308_v2 = vpop.permute.xlu2 %307 }
  0xd2   :  { %v292_v31 = vpop.permute.xlu1 %291 }
  0xda   :  { %v300_v36 = vpop.permute.xlu1 %299 }
  0xdd   :  { %v342_v23 = vpop.permute.xlu2 %341 }
  0xe3   :  { %v210_v51 = vpop.permute.xlu1 %209 }
  0xec   :  { %v316_v8 = vpop.permute.xlu1 %315 }
 0x13c   :  { %v254_v33 = vpop.f32.mrf.mxu0  ;;  %v260_v34 = vpop.f32.mrf.mxu1 }
 0x13d   :  { %v255_v37 = vadd.f32 %v254_v33, %v182_v25  ;;  %v261_v38 = vadd.f32 %v260_v34, %v190_v26 }
 0x13f   :  { %v278_v43 = vmax.f32 %v255_v37, 0.0  ;;  %v280_v47 = vmax.f32 %v261_v38, 0.0 }
 0x141   :  { %v318_v52 = vmul.f32 %v288_v35, %v278_v43  ;;  %v320_v55 = vmul.f32 %v296_v32, %v280_v47 }
 0x143   :  { %v266_v39 = vpop.f32.mrf.mxu2  ;;  %v272_v40 = vpop.f32.mrf.mxu3 }
 0x144   :  { %v257_v41 = vpop.f32.mrf.mxu0  ;;  %v263_v42 = vpop.f32.mrf.mxu1  ;;  %v267_v48 = vadd.f32 %v266_v39, %v198_v28  ;;  %v273_v57 = vadd.f32 %v272_v40, %v206_v46 }
 0x145   :  { %v258_v44 = vadd.f32 %v257_v41, %v186_v30  ;;  %v264_v45 = vadd.f32 %v263_v42, %v194_v27 }
 0x146   :  { %v282_v56 = vmax.f32 %v267_v48, 0.0  ;;  %v284_v9 = vmax.f32 %v273_v57, 0.0 }
 0x147   :  { %v279_v49 = vmax.f32 %v258_v44, 0.0  ;;  %v281_v54 = vmax.f32 %v264_v45, 0.0 }
 0x148   :  { %v322_v5 = vmul.f32 %v304_v50, %v282_v56  ;;  %v324_v1 = vmul.f32 %v312_v16, %v284_v9 }
 0x149   :  { %v319_v53 = vmul.f32 %v292_v31, %v279_v49  ;;  %v321_v62 = vmul.f32 %v300_v36, %v281_v54 }
 0x14b   :  { %v326_v58 = vadd.f32 %v319_v53, %v318_v52  ;;  %v269_v59 = vpop.f32.mrf.mxu2  ;;  %v275_v60 = vpop.f32.mrf.mxu3 }
 0x14c   :  { %v270_v61 = vadd.f32 %v269_v59, %v202_v29  ;;  %v276_v3 = vadd.f32 %v275_v60, %v210_v51 }
 0x14d   :  { %v327_v63 = vadd.f32 %v326_v58, %v320_v55 }
 0x14e   :  { %v283_v4 = vmax.f32 %v270_v61, 0.0  ;;  %v285_v12 = vmax.f32 %v276_v3, 0.0 }
 0x14f   :  { %v328_v11 = vadd.f32 %v327_v63, %v321_v62 }
 0x150   :  { %v323_v13 = vmul.f32 %v308_v2, %v283_v4  ;;  %v325_v17 = vmul.f32 %v316_v8, %v285_v12 }
 0x151   :  { %v329_v14 = vadd.f32 %v328_v11, %v322_v5 }
 0x153   :  { %v330_v10 = vadd.f32 %v329_v14, %v323_v13 }
 0x155   :  { %v331_v18 = vadd.f32 %v330_v10, %v324_v1 }
 0x157   :  { %v332_v19 = vadd.f32 %v331_v18, %v325_v17 }
 0x159   :  { %v333_v20 = vrot.slane %v332_v19, 4 }
 0x15b   :  { %v334_v21 = vadd.f32 %v333_v20, %v332_v19 }
 0x15d   :  { %v335_v6 = vrot.slane %v334_v21, 2 }
 0x15f   :  { %v336_v15 = vadd.f32 %v335_v6, %v334_v21 }
 0x161   :  { %v337_v22 = vrot.slane %v336_v15, 1 }
 0x163   :  { %v338_v24 = vadd.f32 %v337_v22, %v336_v15 }
 0x165   :  { %v344_v0 = vadd.f32 %v342_v23, %v338_v24 }
 0x167   :  { %345 = vst [vmem:[#allocation2] sm:$0x1] %v344_v0 }
 0x168   :  { %356 = dma.vmem_to_hbm [thread:$0]  %s352_s2, 16, %s354_s24, [#allocation3]  }
 0x169   :  { %452 = dma.done.wait [#allocation3], 16  }
 0x16a   :  { %453 = vsyncadd [#allocation3], 4294967280 }
 0x16b   :  { %361 = vsyncpa [#allocation3], 1 }

</bundles_post_ra>
